<compile_context>
chip_gen: v5e
topology: v5e:2x2
jax: 0.10.0
libtpu: 0.0.40
codegen_flags: <defaults>
</compile_context>

<pallas_src>
import numpy as np
import jax
import jax.numpy as jnp
from jax import lax
from jax.experimental import pallas as pl
from jax.experimental.pallas import tpu as pltpu

BN_EPS = 1e-5
LANE = 128
SUBLANE_BF16 = 16  # bf16 packs (16, 128) per vreg -> pad batch to a multiple of 16


def ffnn_hidden_sizes(ni: int, no: int, nl: int):
    # mirrors torch.arange(ni, no, (no - ni) / nl, dtype=torch.int)
    step = (no - ni) / nl
    nh = np.arange(ni, no, step)
    return [int(v) for v in nh]


def _round_up(n: int, m: int) -> int:
    return ((n + m - 1) // m) * m


def make_mlp_kernel(num_hidden: int, bn_eps: float, true_b: int, b_pad: int,
                    nslots: int, nd_g_pad: int):
    """Kernel refs: (cols, [W, b, gamma, beta] * num_hidden, W_tail, b_tail, mu_out).

    cols is int32 (b_pad, nslots_pad): global one-hot column index per (row, slot),
    -1 in padded rows/slots (never matches).  W / W_tail are bf16 (MXU operands);
    biases / gamma / beta / statistics / mu are f32.
    """
    inv_b = 1.0 / float(true_b)
    needs_row_mask = (b_pad != true_b)

    def kernel(*refs):
        cols_ref = refs[0]
        idx = 1

        # --- build the one-hot input in VMEM from int32 column indices ---
        # Slots occupy disjoint column ranges, so a per-slot select assembles the
        # full one-hot exactly.  Padded rows/slots carry -1 and never match.
        cols = cols_ref[...]                                          # (b_pad, nslots_pad) i32
        col_iota = lax.broadcasted_iota(jnp.int32, (b_pad, nd_g_pad), 1)
        g = jnp.zeros((b_pad, nd_g_pad), jnp.float32)
        for s in range(nslots):
            g = jnp.where(col_iota == cols[:, s:s + 1], 1.0, g)
        h = g.astype(jnp.bfloat16)

        if needs_row_mask:
            row = lax.broadcasted_iota(jnp.int32, (b_pad, 1), 0)
            rmask = (row < true_b).astype(jnp.float32)

        for _ in range(num_hidden):
            W = refs[idx][...]        # bf16 (in_pad, out_pad)
            b = refs[idx + 1][...]    # f32  (1, out_pad)
            gamma = refs[idx + 2][...]
            beta = refs[idx + 3][...]
            idx += 4

            # Linear (bf16 operands, f32 accumulation) + ReLU in f32
            h = jnp.dot(h, W, preferred_element_type=jnp.float32) + b
            h = jnp.maximum(h, 0.0)
            if needs_row_mask:
                h = h * rmask  # single mask multiply; padded rows become exact 0

            # BatchNorm1d, training-mode batch stats (biased variance), f32.
            # No `diff` intermediate: var = E[h^2] - mean^2, h <- h*scale + shift.
            s1 = jnp.sum(h, axis=0, keepdims=True)
            s2 = jnp.sum(h * h, axis=0, keepdims=True)
            mean = s1 * inv_b
            var = s2 * inv_b - mean * mean
            scale = gamma * lax.rsqrt(var + bn_eps)
            shift = beta - mean * scale
            h = (h * scale + shift).astype(jnp.bfloat16)

        W_tail = refs[idx][...]       # bf16 (last_pad, nd_y_pad)
        b_tail = refs[idx + 1][...]   # f32  (1, nd_y_pad)
        mu_ref = refs[idx + 2]
        mu_ref[...] = jnp.dot(h, W_tail, preferred_element_type=jnp.float32) + b_tail

    return kernel


class FFNNZeroSortPallas:
    def __init__(self, nd_n, nk_n, nk_e, nd_y, nl, min_sigma=1e-8, seed=0):
        self.nd_n = nd_n
        self.nd_l = nd_n * (nd_n - 1) // 2
        self.nk_n = nk_n
        self.nk_e = nk_e
        self.nd_y = nd_y
        self.min_sigma = min_sigma
        self.nd_g = nd_n * nk_n + self.nd_l * nk_e

        nh = ffnn_hidden_sizes(self.nd_g, nd_y, nl)
        self.nh = nh

        key = jax.random.PRNGKey(seed)

        def linear_init(k, fan_in, fan_out):
            k1, k2 = jax.random.split(k)
            bound = 1.0 / np.sqrt(fan_in)
            W = jax.random.uniform(k1, (fan_in, fan_out), jnp.float32, -bound, bound)
            b = jax.random.uniform(k2, (1, fan_out), jnp.float32, -bound, bound)
            return W, b

        # --- raw f32 parameters (kept for the reference paths) ---
        self.hidden = []  # list of (W, b, gamma, beta)
        for i in range(len(nh) - 1):
            key, sub = jax.random.split(key)
            W, b = linear_init(sub, nh[i], nh[i + 1])
            gamma = jnp.ones((1, nh[i + 1]), jnp.float32)
            beta = jnp.zeros((1, nh[i + 1]), jnp.float32)
            self.hidden.append((W, b, gamma, beta))

        key, sub = jax.random.split(key)
        self.W_out, self.b_out = linear_init(sub, nh[-1], nd_y)
        key, sub = jax.random.split(key)
        self.W_mu, self.b_mu = linear_init(sub, nd_y, nd_y)
        key, sub = jax.random.split(key)
        self.sigma_params = jax.random.normal(sub, (1, nd_y), jnp.float32)

        # --- fold the two tail Linears (no nonlinearity between them) ---
        self.W_tail = self.W_out @ self.W_mu                 # (nh[-1], nd_y)
        self.b_tail = self.b_out @ self.W_mu + self.b_mu     # (1, nd_y)

        # --- sigma is input-independent: compute once ---
        self.sigma_row = jax.nn.softplus(self.sigma_params) + min_sigma  # (1, nd_y)

        # --- padded / bf16 parameters for the kernel ---
        self.nd_g_pad = _round_up(self.nd_g, LANE)
        self.nd_y_pad = _round_up(nd_y, LANE)

        self.hidden_pad = []  # list of (W bf16, b f32, gamma f32, beta f32), 128-padded
        for i, (W, b, gm, bt) in enumerate(self.hidden):
            ip = _round_up(nh[i], LANE)
            op = _round_up(nh[i + 1], LANE)
            Wp = jnp.zeros((ip, op), jnp.float32).at[:nh[i], :nh[i + 1]].set(W)
            bp = jnp.zeros((1, op), jnp.float32).at[:, :nh[i + 1]].set(b)
            gp = jnp.zeros((1, op), jnp.float32).at[:, :nh[i + 1]].set(gm)   # padded gamma = 0
            btp = jnp.zeros((1, op), jnp.float32).at[:, :nh[i + 1]].set(bt)  # padded beta = 0
            self.hidden_pad.append((Wp.astype(jnp.bfloat16), bp, gp, btp))

        last_pad = _round_up(nh[-1], LANE)
        Wt = jnp.zeros((last_pad, self.nd_y_pad), jnp.float32)
        Wt = Wt.at[:nh[-1], :nd_y].set(self.W_tail)
        self.W_tail_pad = Wt.astype(jnp.bfloat16)
        self.b_tail_pad = jnp.zeros((1, self.nd_y_pad), jnp.float32).at[:, :nd_y].set(self.b_tail)

        # strictly-lower-triangular indices, row-major (matches torch boolean mask order)
        rows, cols = np.tril_indices(nd_n, k=-1)
        self.tri_rows = jnp.asarray(rows, dtype=jnp.int32)
        self.tri_cols = jnp.asarray(cols, dtype=jnp.int32)

        # per-slot global column offsets into the flattened one-hot vector
        node_off = np.arange(nd_n, dtype=np.int32) * nk_n
        edge_off = nd_n * nk_n + np.arange(self.nd_l, dtype=np.int32) * nk_e
        self.col_offsets = jnp.asarray(np.concatenate([node_off, edge_off]), jnp.int32)
        self.nslots = nd_n + self.nd_l
        self.nslots_pad = _round_up(self.nslots, LANE)

    # --- glue (pure JAX): one-hot flattening of the graph (reference paths only) ---
    def _flatten_graph(self, x, a):
        B = x.shape[0]
        l = a[:, self.tri_rows, self.tri_cols]                      # (B, nd_l)
        x_ohe = jax.nn.one_hot(x, self.nk_n, dtype=jnp.float32)     # (B, nd_n, nk_n)
        l_ohe = jax.nn.one_hot(l, self.nk_e, dtype=jnp.float32)     # (B, nd_l, nk_e)
        return jnp.concatenate(
            [x_ohe.reshape(B, -1), l_ohe.reshape(B, -1)], axis=-1)  # (B, nd_g)

    # --- fused Pallas forward ---
    def __call__(self, x, a):
        B = x.shape[0]
        B_pad = _round_up(B, SUBLANE_BF16)

        # int32 label -> global one-hot column index; only this tiny table crosses HBM
        l = a[:, self.tri_rows, self.tri_cols]                       # (B, nd_l)
        labels = jnp.concatenate([x, l], axis=-1).astype(jnp.int32)  # (B, nslots)
        cols = labels + self.col_offsets[None, :]
        cols_pad = jnp.full((B_pad, self.nslots_pad), -1, jnp.int32)
        cols_pad = cols_pad.at[:B, :self.nslots].set(cols)

        flat_inputs = [cols_pad]
        for p in self.hidden_pad:
            flat_inputs += list(p)
        flat_inputs += [self.W_tail_pad, self.b_tail_pad]

        kernel = make_mlp_kernel(len(self.hidden_pad), BN_EPS, B, B_pad,
                                 self.nslots, self.nd_g_pad)
        vmem = pl.BlockSpec(memory_space=pltpu.MemorySpace.VMEM)

        # advisory cost estimate for the XLA scheduler
        flops = self.nslots * B_pad * self.nd_g_pad            # in-kernel one-hot selects
        transcendentals = 0
        for (Wp, _, _, _) in self.hidden_pad:
            flops += 2 * B_pad * Wp.shape[0] * Wp.shape[1]      # matmul
            flops += 8 * B_pad * Wp.shape[1]                    # ReLU + BN elementwise
            transcendentals += Wp.shape[1]                      # one rsqrt per feature
        flops += 2 * B_pad * self.W_tail_pad.shape[0] * self.W_tail_pad.shape[1]
        in_bytes = sum(int(np.prod(t.shape)) * jnp.dtype(t.dtype).itemsize
                       for t in flat_inputs)
        out_bytes = B_pad * self.nd_y_pad * 4
        bytes_accessed = in_bytes + out_bytes

        # size the VMEM limit from the real footprint; cap at 48 MiB (v7x has only
        # 64 MiB physical VMEM per TensorCore, v5e/v6e have 128 MiB)
        widths = [self.nd_g_pad] + [Wp.shape[1] for (Wp, _, _, _) in self.hidden_pad] \
                 + [self.nd_y_pad]
        act_bytes = 4 * B_pad * max(widths) * 4   # a few live f32 activation tensors
        vmem_limit = int(min(max(2 * (in_bytes + out_bytes) + act_bytes + (2 << 20),
                                 16 << 20),
                             48 << 20))

        mu_pad = pl.pallas_call(
            kernel,
            out_shape=jax.ShapeDtypeStruct((B_pad, self.nd_y_pad), jnp.float32),
            in_specs=[vmem] * len(flat_inputs),
            out_specs=vmem,
            compiler_params=pltpu.CompilerParams(vmem_limit_bytes=vmem_limit),
            cost_estimate=pl.CostEstimate(
                flops=int(flops),
                transcendentals=int(transcendentals),
                bytes_accessed=int(bytes_accessed)),
        )(*flat_inputs)

        mu = mu_pad[:B, :self.nd_y]
        sigma = jnp.broadcast_to(self.sigma_row, (B, self.nd_y))
        return mu, sigma

    # --- pure-JAX reference, exact module semantics (f32, unfolded tail) ---
    def reference(self, x, a):
        h = self._flatten_graph(x, a)
        for (W, b, gm, bt) in self.hidden:
            h = h @ W + b
            h = jnp.maximum(h, 0.0)
            mean = jnp.mean(h, axis=0, keepdims=True)
            var = jnp.mean((h - mean) ** 2, axis=0, keepdims=True)
            h = gm * (h - mean) / jnp.sqrt(var + BN_EPS) + bt
        params = h @ self.W_out + self.b_out
        mu = params @ self.W_mu + self.b_mu
        sigma = jnp.broadcast_to(self.sigma_row, mu.shape)
        return mu, sigma

    # --- pure-JAX reference matching the kernel's math (bf16 MXU, folded tail, E[h^2] BN) ---
    def reference_matched(self, x, a):
        h = self._flatten_graph(x, a).astype(jnp.bfloat16)
        for (W, b, gm, bt) in self.hidden:
            h = jnp.dot(h, W.astype(jnp.bfloat16),
                        preferred_element_type=jnp.float32) + b
            h = jnp.maximum(h, 0.0)
            mean = jnp.mean(h, axis=0, keepdims=True)
            var = jnp.mean(h * h, axis=0, keepdims=True) - mean * mean
            scale = gm * lax.rsqrt(var + BN_EPS)
            shift = bt - mean * scale
            h = (h * scale + shift).astype(jnp.bfloat16)
        mu = jnp.dot(h, self.W_tail.astype(jnp.bfloat16),
                     preferred_element_type=jnp.float32) + self.b_tail
        sigma = jnp.broadcast_to(self.sigma_row, mu.shape)
        return mu, sigma


if __name__ == "__main__":
    # small, forward-consistent shapes
    nd_n, nk_n, nk_e, nd_y, nl = 8, 4, 3, 32, 2
    B = 4

    model = FFNNZeroSortPallas(nd_n, nk_n, nk_e, nd_y, nl, min_sigma=1e-8, seed=0)

    key = jax.random.PRNGKey(0)
    kx, ka = jax.random.split(key)
    x = jax.random.randint(kx, (B, nd_n), 0, nk_n, dtype=jnp.int32)          # node labels
    a = jax.random.randint(ka, (B, nd_n, nd_n), 0, nk_e, dtype=jnp.int32)    # edge labels

    mu, sigma = model(x, a)
    jax.block_until_ready((mu, sigma))

    assert mu.shape == (B, nd_y) and sigma.shape == (B, nd_y)

    # strict check vs a reference that uses the same (folded tail, bf16-MXU, E[h^2]) math
    mu_m, sigma_m = model.reference_matched(x, a)
    assert jnp.allclose(mu, mu_m, atol=1e-2, rtol=1e-2)
    assert jnp.allclose(sigma, sigma_m, atol=1e-6, rtol=1e-6)

    # looser check vs the exact original-module semantics (f32, unfolded tail)
    mu_f, sigma_f = model.reference(x, a)
    assert jnp.allclose(mu, mu_f, atol=5e-2, rtol=5e-2)
    assert jnp.allclose(sigma, sigma_f, atol=1e-6, rtol=1e-6)

    print("KERNEL_OK")
</pallas_src>

<mosaic_0001>
module attributes {stable_mosaic.version = 11 : i64} {
  func.func @kernel(%arg0: memref<16x128xi32, #tpu.memory_space<vmem>>, %arg1: memref<128x128xbf16, #tpu.memory_space<vmem>>, %arg2: memref<1x128xf32, #tpu.memory_space<vmem>>, %arg3: memref<1x128xf32, #tpu.memory_space<vmem>>, %arg4: memref<1x128xf32, #tpu.memory_space<vmem>>, %arg5: memref<128x128xbf16, #tpu.memory_space<vmem>>, %arg6: memref<1x128xf32, #tpu.memory_space<vmem>>, %arg7: memref<16x128xf32, #tpu.memory_space<vmem>>) attributes {dimension_semantics = [], scalar_prefetch = 0 : i64, scratch_operands = 0 : i64, tpu.core_type = #tpu.core_type<tc>} {
    %c0 = arith.constant 0 : index
    %c0_0 = arith.constant 0 : index
    %0 = vector.load %arg0[%c0, %c0_0] : memref<16x128xi32, #tpu.memory_space<vmem>>, vector<16x128xi32>
    %1 = tpu.iota {dimensions = array<i32: 1>} : vector<16x128xi32>
    %cst = arith.constant 0.000000e+00 : f32
    %2 = vector.broadcast %cst : f32 to vector<16x128xf32>
    %3 = vector.extract_strided_slice %0 {offsets = [0, 0], sizes = [16, 1], strides = [1, 1]} : vector<16x128xi32> to vector<16x1xi32>
    %4 = vector.broadcast %3 : vector<16x1xi32> to vector<16x128xi32>
    %5 = arith.cmpi eq, %1, %4 : vector<16x128xi32>
    %cst_1 = arith.constant 1.000000e+00 : f32
    %6 = vector.broadcast %cst_1 : f32 to vector<16x128xf32>
    %7 = arith.select %5, %6, %2 : vector<16x128xi1>, vector<16x128xf32>
    %8 = vector.extract_strided_slice %0 {offsets = [0, 1], sizes = [16, 1], strides = [1, 1]} : vector<16x128xi32> to vector<16x1xi32>
    %9 = vector.broadcast %8 : vector<16x1xi32> to vector<16x128xi32>
    %10 = arith.cmpi eq, %1, %9 : vector<16x128xi32>
    %cst_2 = arith.constant 1.000000e+00 : f32
    %11 = vector.broadcast %cst_2 : f32 to vector<16x128xf32>
    %12 = arith.select %10, %11, %7 : vector<16x128xi1>, vector<16x128xf32>
    %13 = vector.extract_strided_slice %0 {offsets = [0, 2], sizes = [16, 1], strides = [1, 1]} : vector<16x128xi32> to vector<16x1xi32>
    %14 = vector.broadcast %13 : vector<16x1xi32> to vector<16x128xi32>
    %15 = arith.cmpi eq, %1, %14 : vector<16x128xi32>
    %cst_3 = arith.constant 1.000000e+00 : f32
    %16 = vector.broadcast %cst_3 : f32 to vector<16x128xf32>
    %17 = arith.select %15, %16, %12 : vector<16x128xi1>, vector<16x128xf32>
    %18 = vector.extract_strided_slice %0 {offsets = [0, 3], sizes = [16, 1], strides = [1, 1]} : vector<16x128xi32> to vector<16x1xi32>
    %19 = vector.broadcast %18 : vector<16x1xi32> to vector<16x128xi32>
    %20 = arith.cmpi eq, %1, %19 : vector<16x128xi32>
    %cst_4 = arith.constant 1.000000e+00 : f32
    %21 = vector.broadcast %cst_4 : f32 to vector<16x128xf32>
    %22 = arith.select %20, %21, %17 : vector<16x128xi1>, vector<16x128xf32>
    %23 = vector.extract_strided_slice %0 {offsets = [0, 4], sizes = [16, 1], strides = [1, 1]} : vector<16x128xi32> to vector<16x1xi32>
    %24 = vector.broadcast %23 : vector<16x1xi32> to vector<16x128xi32>
    %25 = arith.cmpi eq, %1, %24 : vector<16x128xi32>
    %cst_5 = arith.constant 1.000000e+00 : f32
    %26 = vector.broadcast %cst_5 : f32 to vector<16x128xf32>
    %27 = arith.select %25, %26, %22 : vector<16x128xi1>, vector<16x128xf32>
    %28 = vector.extract_strided_slice %0 {offsets = [0, 5], sizes = [16, 1], strides = [1, 1]} : vector<16x128xi32> to vector<16x1xi32>
    %29 = vector.broadcast %28 : vector<16x1xi32> to vector<16x128xi32>
    %30 = arith.cmpi eq, %1, %29 : vector<16x128xi32>
    %cst_6 = arith.constant 1.000000e+00 : f32
    %31 = vector.broadcast %cst_6 : f32 to vector<16x128xf32>
    %32 = arith.select %30, %31, %27 : vector<16x128xi1>, vector<16x128xf32>
    %33 = vector.extract_strided_slice %0 {offsets = [0, 6], sizes = [16, 1], strides = [1, 1]} : vector<16x128xi32> to vector<16x1xi32>
    %34 = vector.broadcast %33 : vector<16x1xi32> to vector<16x128xi32>
    %35 = arith.cmpi eq, %1, %34 : vector<16x128xi32>
    %cst_7 = arith.constant 1.000000e+00 : f32
    %36 = vector.broadcast %cst_7 : f32 to vector<16x128xf32>
    %37 = arith.select %35, %36, %32 : vector<16x128xi1>, vector<16x128xf32>
    %38 = vector.extract_strided_slice %0 {offsets = [0, 7], sizes = [16, 1], strides = [1, 1]} : vector<16x128xi32> to vector<16x1xi32>
    %39 = vector.broadcast %38 : vector<16x1xi32> to vector<16x128xi32>
    %40 = arith.cmpi eq, %1, %39 : vector<16x128xi32>
    %cst_8 = arith.constant 1.000000e+00 : f32
    %41 = vector.broadcast %cst_8 : f32 to vector<16x128xf32>
    %42 = arith.select %40, %41, %37 : vector<16x128xi1>, vector<16x128xf32>
    %43 = vector.extract_strided_slice %0 {offsets = [0, 8], sizes = [16, 1], strides = [1, 1]} : vector<16x128xi32> to vector<16x1xi32>
    %44 = vector.broadcast %43 : vector<16x1xi32> to vector<16x128xi32>
    %45 = arith.cmpi eq, %1, %44 : vector<16x128xi32>
    %cst_9 = arith.constant 1.000000e+00 : f32
    %46 = vector.broadcast %cst_9 : f32 to vector<16x128xf32>
    %47 = arith.select %45, %46, %42 : vector<16x128xi1>, vector<16x128xf32>
    %48 = vector.extract_strided_slice %0 {offsets = [0, 9], sizes = [16, 1], strides = [1, 1]} : vector<16x128xi32> to vector<16x1xi32>
    %49 = vector.broadcast %48 : vector<16x1xi32> to vector<16x128xi32>
    %50 = arith.cmpi eq, %1, %49 : vector<16x128xi32>
    %cst_10 = arith.constant 1.000000e+00 : f32
    %51 = vector.broadcast %cst_10 : f32 to vector<16x128xf32>
    %52 = arith.select %50, %51, %47 : vector<16x128xi1>, vector<16x128xf32>
    %53 = vector.extract_strided_slice %0 {offsets = [0, 10], sizes = [16, 1], strides = [1, 1]} : vector<16x128xi32> to vector<16x1xi32>
    %54 = vector.broadcast %53 : vector<16x1xi32> to vector<16x128xi32>
    %55 = arith.cmpi eq, %1, %54 : vector<16x128xi32>
    %cst_11 = arith.constant 1.000000e+00 : f32
    %56 = vector.broadcast %cst_11 : f32 to vector<16x128xf32>
    %57 = arith.select %55, %56, %52 : vector<16x128xi1>, vector<16x128xf32>
    %58 = vector.extract_strided_slice %0 {offsets = [0, 11], sizes = [16, 1], strides = [1, 1]} : vector<16x128xi32> to vector<16x1xi32>
    %59 = vector.broadcast %58 : vector<16x1xi32> to vector<16x128xi32>
    %60 = arith.cmpi eq, %1, %59 : vector<16x128xi32>
    %cst_12 = arith.constant 1.000000e+00 : f32
    %61 = vector.broadcast %cst_12 : f32 to vector<16x128xf32>
    %62 = arith.select %60, %61, %57 : vector<16x128xi1>, vector<16x128xf32>
    %63 = vector.extract_strided_slice %0 {offsets = [0, 12], sizes = [16, 1], strides = [1, 1]} : vector<16x128xi32> to vector<16x1xi32>
    %64 = vector.broadcast %63 : vector<16x1xi32> to vector<16x128xi32>
    %65 = arith.cmpi eq, %1, %64 : vector<16x128xi32>
    %cst_13 = arith.constant 1.000000e+00 : f32
    %66 = vector.broadcast %cst_13 : f32 to vector<16x128xf32>
    %67 = arith.select %65, %66, %62 : vector<16x128xi1>, vector<16x128xf32>
    %68 = vector.extract_strided_slice %0 {offsets = [0, 13], sizes = [16, 1], strides = [1, 1]} : vector<16x128xi32> to vector<16x1xi32>
    %69 = vector.broadcast %68 : vector<16x1xi32> to vector<16x128xi32>
    %70 = arith.cmpi eq, %1, %69 : vector<16x128xi32>
    %cst_14 = arith.constant 1.000000e+00 : f32
    %71 = vector.broadcast %cst_14 : f32 to vector<16x128xf32>
    %72 = arith.select %70, %71, %67 : vector<16x128xi1>, vector<16x128xf32>
    %73 = vector.extract_strided_slice %0 {offsets = [0, 14], sizes = [16, 1], strides = [1, 1]} : vector<16x128xi32> to vector<16x1xi32>
    %74 = vector.broadcast %73 : vector<16x1xi32> to vector<16x128xi32>
    %75 = arith.cmpi eq, %1, %74 : vector<16x128xi32>
    %cst_15 = arith.constant 1.000000e+00 : f32
    %76 = vector.broadcast %cst_15 : f32 to vector<16x128xf32>
    %77 = arith.select %75, %76, %72 : vector<16x128xi1>, vector<16x128xf32>
    %78 = vector.extract_strided_slice %0 {offsets = [0, 15], sizes = [16, 1], strides = [1, 1]} : vector<16x128xi32> to vector<16x1xi32>
    %79 = vector.broadcast %78 : vector<16x1xi32> to vector<16x128xi32>
    %80 = arith.cmpi eq, %1, %79 : vector<16x128xi32>
    %cst_16 = arith.constant 1.000000e+00 : f32
    %81 = vector.broadcast %cst_16 : f32 to vector<16x128xf32>
    %82 = arith.select %80, %81, %77 : vector<16x128xi1>, vector<16x128xf32>
    %83 = vector.extract_strided_slice %0 {offsets = [0, 16], sizes = [16, 1], strides = [1, 1]} : vector<16x128xi32> to vector<16x1xi32>
    %84 = vector.broadcast %83 : vector<16x1xi32> to vector<16x128xi32>
    %85 = arith.cmpi eq, %1, %84 : vector<16x128xi32>
    %cst_17 = arith.constant 1.000000e+00 : f32
    %86 = vector.broadcast %cst_17 : f32 to vector<16x128xf32>
    %87 = arith.select %85, %86, %82 : vector<16x128xi1>, vector<16x128xf32>
    %88 = vector.extract_strided_slice %0 {offsets = [0, 17], sizes = [16, 1], strides = [1, 1]} : vector<16x128xi32> to vector<16x1xi32>
    %89 = vector.broadcast %88 : vector<16x1xi32> to vector<16x128xi32>
    %90 = arith.cmpi eq, %1, %89 : vector<16x128xi32>
    %cst_18 = arith.constant 1.000000e+00 : f32
    %91 = vector.broadcast %cst_18 : f32 to vector<16x128xf32>
    %92 = arith.select %90, %91, %87 : vector<16x128xi1>, vector<16x128xf32>
    %93 = vector.extract_strided_slice %0 {offsets = [0, 18], sizes = [16, 1], strides = [1, 1]} : vector<16x128xi32> to vector<16x1xi32>
    %94 = vector.broadcast %93 : vector<16x1xi32> to vector<16x128xi32>
    %95 = arith.cmpi eq, %1, %94 : vector<16x128xi32>
    %cst_19 = arith.constant 1.000000e+00 : f32
    %96 = vector.broadcast %cst_19 : f32 to vector<16x128xf32>
    %97 = arith.select %95, %96, %92 : vector<16x128xi1>, vector<16x128xf32>
    %98 = vector.extract_strided_slice %0 {offsets = [0, 19], sizes = [16, 1], strides = [1, 1]} : vector<16x128xi32> to vector<16x1xi32>
    %99 = vector.broadcast %98 : vector<16x1xi32> to vector<16x128xi32>
    %100 = arith.cmpi eq, %1, %99 : vector<16x128xi32>
    %cst_20 = arith.constant 1.000000e+00 : f32
    %101 = vector.broadcast %cst_20 : f32 to vector<16x128xf32>
    %102 = arith.select %100, %101, %97 : vector<16x128xi1>, vector<16x128xf32>
    %103 = vector.extract_strided_slice %0 {offsets = [0, 20], sizes = [16, 1], strides = [1, 1]} : vector<16x128xi32> to vector<16x1xi32>
    %104 = vector.broadcast %103 : vector<16x1xi32> to vector<16x128xi32>
    %105 = arith.cmpi eq, %1, %104 : vector<16x128xi32>
    %cst_21 = arith.constant 1.000000e+00 : f32
    %106 = vector.broadcast %cst_21 : f32 to vector<16x128xf32>
    %107 = arith.select %105, %106, %102 : vector<16x128xi1>, vector<16x128xf32>
    %108 = vector.extract_strided_slice %0 {offsets = [0, 21], sizes = [16, 1], strides = [1, 1]} : vector<16x128xi32> to vector<16x1xi32>
    %109 = vector.broadcast %108 : vector<16x1xi32> to vector<16x128xi32>
    %110 = arith.cmpi eq, %1, %109 : vector<16x128xi32>
    %cst_22 = arith.constant 1.000000e+00 : f32
    %111 = vector.broadcast %cst_22 : f32 to vector<16x128xf32>
    %112 = arith.select %110, %111, %107 : vector<16x128xi1>, vector<16x128xf32>
    %113 = vector.extract_strided_slice %0 {offsets = [0, 22], sizes = [16, 1], strides = [1, 1]} : vector<16x128xi32> to vector<16x1xi32>
    %114 = vector.broadcast %113 : vector<16x1xi32> to vector<16x128xi32>
    %115 = arith.cmpi eq, %1, %114 : vector<16x128xi32>
    %cst_23 = arith.constant 1.000000e+00 : f32
    %116 = vector.broadcast %cst_23 : f32 to vector<16x128xf32>
    %117 = arith.select %115, %116, %112 : vector<16x128xi1>, vector<16x128xf32>
    %118 = vector.extract_strided_slice %0 {offsets = [0, 23], sizes = [16, 1], strides = [1, 1]} : vector<16x128xi32> to vector<16x1xi32>
    %119 = vector.broadcast %118 : vector<16x1xi32> to vector<16x128xi32>
    %120 = arith.cmpi eq, %1, %119 : vector<16x128xi32>
    %cst_24 = arith.constant 1.000000e+00 : f32
    %121 = vector.broadcast %cst_24 : f32 to vector<16x128xf32>
    %122 = arith.select %120, %121, %117 : vector<16x128xi1>, vector<16x128xf32>
    %123 = vector.extract_strided_slice %0 {offsets = [0, 24], sizes = [16, 1], strides = [1, 1]} : vector<16x128xi32> to vector<16x1xi32>
    %124 = vector.broadcast %123 : vector<16x1xi32> to vector<16x128xi32>
    %125 = arith.cmpi eq, %1, %124 : vector<16x128xi32>
    %cst_25 = arith.constant 1.000000e+00 : f32
    %126 = vector.broadcast %cst_25 : f32 to vector<16x128xf32>
    %127 = arith.select %125, %126, %122 : vector<16x128xi1>, vector<16x128xf32>
    %128 = vector.extract_strided_slice %0 {offsets = [0, 25], sizes = [16, 1], strides = [1, 1]} : vector<16x128xi32> to vector<16x1xi32>
    %129 = vector.broadcast %128 : vector<16x1xi32> to vector<16x128xi32>
    %130 = arith.cmpi eq, %1, %129 : vector<16x128xi32>
    %cst_26 = arith.constant 1.000000e+00 : f32
    %131 = vector.broadcast %cst_26 : f32 to vector<16x128xf32>
    %132 = arith.select %130, %131, %127 : vector<16x128xi1>, vector<16x128xf32>
    %133 = vector.extract_strided_slice %0 {offsets = [0, 26], sizes = [16, 1], strides = [1, 1]} : vector<16x128xi32> to vector<16x1xi32>
    %134 = vector.broadcast %133 : vector<16x1xi32> to vector<16x128xi32>
    %135 = arith.cmpi eq, %1, %134 : vector<16x128xi32>
    %cst_27 = arith.constant 1.000000e+00 : f32
    %136 = vector.broadcast %cst_27 : f32 to vector<16x128xf32>
    %137 = arith.select %135, %136, %132 : vector<16x128xi1>, vector<16x128xf32>
    %138 = vector.extract_strided_slice %0 {offsets = [0, 27], sizes = [16, 1], strides = [1, 1]} : vector<16x128xi32> to vector<16x1xi32>
    %139 = vector.broadcast %138 : vector<16x1xi32> to vector<16x128xi32>
    %140 = arith.cmpi eq, %1, %139 : vector<16x128xi32>
    %cst_28 = arith.constant 1.000000e+00 : f32
    %141 = vector.broadcast %cst_28 : f32 to vector<16x128xf32>
    %142 = arith.select %140, %141, %137 : vector<16x128xi1>, vector<16x128xf32>
    %143 = vector.extract_strided_slice %0 {offsets = [0, 28], sizes = [16, 1], strides = [1, 1]} : vector<16x128xi32> to vector<16x1xi32>
    %144 = vector.broadcast %143 : vector<16x1xi32> to vector<16x128xi32>
    %145 = arith.cmpi eq, %1, %144 : vector<16x128xi32>
    %cst_29 = arith.constant 1.000000e+00 : f32
    %146 = vector.broadcast %cst_29 : f32 to vector<16x128xf32>
    %147 = arith.select %145, %146, %142 : vector<16x128xi1>, vector<16x128xf32>
    %148 = vector.extract_strided_slice %0 {offsets = [0, 29], sizes = [16, 1], strides = [1, 1]} : vector<16x128xi32> to vector<16x1xi32>
    %149 = vector.broadcast %148 : vector<16x1xi32> to vector<16x128xi32>
    %150 = arith.cmpi eq, %1, %149 : vector<16x128xi32>
    %cst_30 = arith.constant 1.000000e+00 : f32
    %151 = vector.broadcast %cst_30 : f32 to vector<16x128xf32>
    %152 = arith.select %150, %151, %147 : vector<16x128xi1>, vector<16x128xf32>
    %153 = vector.extract_strided_slice %0 {offsets = [0, 30], sizes = [16, 1], strides = [1, 1]} : vector<16x128xi32> to vector<16x1xi32>
    %154 = vector.broadcast %153 : vector<16x1xi32> to vector<16x128xi32>
    %155 = arith.cmpi eq, %1, %154 : vector<16x128xi32>
    %cst_31 = arith.constant 1.000000e+00 : f32
    %156 = vector.broadcast %cst_31 : f32 to vector<16x128xf32>
    %157 = arith.select %155, %156, %152 : vector<16x128xi1>, vector<16x128xf32>
    %158 = vector.extract_strided_slice %0 {offsets = [0, 31], sizes = [16, 1], strides = [1, 1]} : vector<16x128xi32> to vector<16x1xi32>
    %159 = vector.broadcast %158 : vector<16x1xi32> to vector<16x128xi32>
    %160 = arith.cmpi eq, %1, %159 : vector<16x128xi32>
    %cst_32 = arith.constant 1.000000e+00 : f32
    %161 = vector.broadcast %cst_32 : f32 to vector<16x128xf32>
    %162 = arith.select %160, %161, %157 : vector<16x128xi1>, vector<16x128xf32>
    %163 = vector.extract_strided_slice %0 {offsets = [0, 32], sizes = [16, 1], strides = [1, 1]} : vector<16x128xi32> to vector<16x1xi32>
    %164 = vector.broadcast %163 : vector<16x1xi32> to vector<16x128xi32>
    %165 = arith.cmpi eq, %1, %164 : vector<16x128xi32>
    %cst_33 = arith.constant 1.000000e+00 : f32
    %166 = vector.broadcast %cst_33 : f32 to vector<16x128xf32>
    %167 = arith.select %165, %166, %162 : vector<16x128xi1>, vector<16x128xf32>
    %168 = vector.extract_strided_slice %0 {offsets = [0, 33], sizes = [16, 1], strides = [1, 1]} : vector<16x128xi32> to vector<16x1xi32>
    %169 = vector.broadcast %168 : vector<16x1xi32> to vector<16x128xi32>
    %170 = arith.cmpi eq, %1, %169 : vector<16x128xi32>
    %cst_34 = arith.constant 1.000000e+00 : f32
    %171 = vector.broadcast %cst_34 : f32 to vector<16x128xf32>
    %172 = arith.select %170, %171, %167 : vector<16x128xi1>, vector<16x128xf32>
    %173 = vector.extract_strided_slice %0 {offsets = [0, 34], sizes = [16, 1], strides = [1, 1]} : vector<16x128xi32> to vector<16x1xi32>
    %174 = vector.broadcast %173 : vector<16x1xi32> to vector<16x128xi32>
    %175 = arith.cmpi eq, %1, %174 : vector<16x128xi32>
    %cst_35 = arith.constant 1.000000e+00 : f32
    %176 = vector.broadcast %cst_35 : f32 to vector<16x128xf32>
    %177 = arith.select %175, %176, %172 : vector<16x128xi1>, vector<16x128xf32>
    %178 = vector.extract_strided_slice %0 {offsets = [0, 35], sizes = [16, 1], strides = [1, 1]} : vector<16x128xi32> to vector<16x1xi32>
    %179 = vector.broadcast %178 : vector<16x1xi32> to vector<16x128xi32>
    %180 = arith.cmpi eq, %1, %179 : vector<16x128xi32>
    %cst_36 = arith.constant 1.000000e+00 : f32
    %181 = vector.broadcast %cst_36 : f32 to vector<16x128xf32>
    %182 = arith.select %180, %181, %177 : vector<16x128xi1>, vector<16x128xf32>
    %183 = arith.truncf %182 : vector<16x128xf32> to vector<16x128xbf16>
    %184 = tpu.iota {dimensions = array<i32: 0>} : vector<16x1xi32>
    %c4_i32 = arith.constant 4 : i32
    %185 = vector.broadcast %c4_i32 : i32 to vector<16x1xi32>
    %186 = arith.cmpi slt, %184, %185 : vector<16x1xi32>
    %187 = arith.extui %186 : vector<16x1xi1> to vector<16x1xi32>
    %188 = arith.sitofp %187 : vector<16x1xi32> to vector<16x1xf32>
    %c0_37 = arith.constant 0 : index
    %c0_38 = arith.constant 0 : index
    %189 = vector.load %arg1[%c0_37, %c0_38] : memref<128x128xbf16, #tpu.memory_space<vmem>>, vector<128x128xbf16>
    %c0_39 = arith.constant 0 : index
    %c0_40 = arith.constant 0 : index
    %190 = vector.load %arg2[%c0_39, %c0_40] : memref<1x128xf32, #tpu.memory_space<vmem>>, vector<1x128xf32>
    %c0_41 = arith.constant 0 : index
    %c0_42 = arith.constant 0 : index
    %191 = vector.load %arg3[%c0_41, %c0_42] : memref<1x128xf32, #tpu.memory_space<vmem>>, vector<1x128xf32>
    %c0_43 = arith.constant 0 : index
    %c0_44 = arith.constant 0 : index
    %192 = vector.load %arg4[%c0_43, %c0_44] : memref<1x128xf32, #tpu.memory_space<vmem>>, vector<1x128xf32>
    %cst_45 = arith.constant dense<0.000000e+00> : vector<16x128xf32>
    %193 = tpu.matmul %183, %189, %cst_45 {dimension_numbers = #tpu.dot_dimension_numbers<[1], [0], [0], [1], [0, 0, 1, 1], [], []>} : vector<16x128xbf16>, vector<128x128xbf16>, vector<16x128xf32> -> vector<16x128xf32>
    %194 = vector.broadcast %190 : vector<1x128xf32> to vector<16x128xf32>
    %195 = arith.addf %193, %194 : vector<16x128xf32>
    %cst_46 = arith.constant 0.000000e+00 : f32
    %196 = vector.broadcast %cst_46 : f32 to vector<16x128xf32>
    %197 = arith.maximumf %195, %196 : vector<16x128xf32>
    %198 = vector.broadcast %188 : vector<16x1xf32> to vector<16x128xf32>
    %199 = arith.mulf %197, %198 : vector<16x128xf32>
    %cst_47 = arith.constant dense<0.000000e+00> : vector<128xf32>
    %200 = vector.multi_reduction <add>, %199, %cst_47 [0] : vector<16x128xf32> to vector<128xf32>
    %201 = vector.shape_cast %200 : vector<128xf32> to vector<1x128xf32>
    %202 = arith.mulf %199, %199 : vector<16x128xf32>
    %cst_48 = arith.constant dense<0.000000e+00> : vector<128xf32>
    %203 = vector.multi_reduction <add>, %202, %cst_48 [0] : vector<16x128xf32> to vector<128xf32>
    %204 = vector.shape_cast %203 : vector<128xf32> to vector<1x128xf32>
    %cst_49 = arith.constant 2.500000e-01 : f32
    %205 = vector.broadcast %cst_49 : f32 to vector<1x128xf32>
    %206 = arith.mulf %201, %205 : vector<1x128xf32>
    %cst_50 = arith.constant 2.500000e-01 : f32
    %207 = vector.broadcast %cst_50 : f32 to vector<1x128xf32>
    %208 = arith.mulf %204, %207 : vector<1x128xf32>
    %209 = arith.mulf %206, %206 : vector<1x128xf32>
    %210 = arith.subf %208, %209 : vector<1x128xf32>
    %cst_51 = arith.constant 9.99999974E-6 : f32
    %211 = vector.broadcast %cst_51 : f32 to vector<1x128xf32>
    %212 = arith.addf %210, %211 : vector<1x128xf32>
    %213 = math.rsqrt %212 : vector<1x128xf32>
    %214 = arith.mulf %191, %213 : vector<1x128xf32>
    %215 = arith.mulf %206, %214 : vector<1x128xf32>
    %216 = arith.subf %192, %215 : vector<1x128xf32>
    %217 = vector.broadcast %214 : vector<1x128xf32> to vector<16x128xf32>
    %218 = arith.mulf %199, %217 : vector<16x128xf32>
    %219 = vector.broadcast %216 : vector<1x128xf32> to vector<16x128xf32>
    %220 = arith.addf %218, %219 : vector<16x128xf32>
    %221 = arith.truncf %220 : vector<16x128xf32> to vector<16x128xbf16>
    %c0_52 = arith.constant 0 : index
    %c0_53 = arith.constant 0 : index
    %222 = vector.load %arg5[%c0_52, %c0_53] : memref<128x128xbf16, #tpu.memory_space<vmem>>, vector<128x128xbf16>
    %c0_54 = arith.constant 0 : index
    %c0_55 = arith.constant 0 : index
    %223 = vector.load %arg6[%c0_54, %c0_55] : memref<1x128xf32, #tpu.memory_space<vmem>>, vector<1x128xf32>
    %cst_56 = arith.constant dense<0.000000e+00> : vector<16x128xf32>
    %224 = tpu.matmul %221, %222, %cst_56 {dimension_numbers = #tpu.dot_dimension_numbers<[1], [0], [0], [1], [0, 0, 1, 1], [], []>} : vector<16x128xbf16>, vector<128x128xbf16>, vector<16x128xf32> -> vector<16x128xf32>
    %225 = vector.broadcast %223 : vector<1x128xf32> to vector<16x128xf32>
    %226 = arith.addf %224, %225 : vector<16x128xf32>
    %c0_57 = arith.constant 0 : index
    %c0_58 = arith.constant 0 : index
    %227 = vector.load %arg7[%c0_57, %c0_58] : memref<16x128xf32, #tpu.memory_space<vmem>>, vector<16x128xf32>
    tpu.vector_store %arg7[%c0_57, %c0_58], %226 {strides = array<i32>} : memref<16x128xf32, #tpu.memory_space<vmem>>, vector<16x128xf32>,
    return
  }
}

</mosaic_0001>

<bundles_post_ra>
// kernel: tpu_custom_call.1
= control target key start
LH: loop header
LB: loop body
LE: loop exit
PB: predicated region body
PF: predicated region fallthrough
CT: control target
= control target key end

     0   :  { %12 = vsyncpa [#allocation3], 0  ;;  %s1260_s0 = inlined_call_operand.hbm [shape: s32[16,128], index: 0, kind: input, shape index: {}]   ;;  %s1261_s1 = inlined_call_operand.hbm [shape: bf16[128,128], index: 1, kind: input, shape index: {}]   ;;  %s1262_s2 = inlined_call_operand.vmem [shape: f32[1,128], index: 2, kind: input, shape index: {}]   ;;  %s1263_s3 = inlined_call_operand.vmem [shape: f32[1,128], index: 3, kind: input, shape index: {}]   ;;  %s1264_s4 = inlined_call_operand.vmem [shape: f32[1,128], index: 4, kind: input, shape index: {}]   ;;  %s1265_s5 = inlined_call_operand.hbm [shape: bf16[128,128], index: 5, kind: input, shape index: {}]   ;;  %s1266_s6 = inlined_call_operand.vmem [shape: f32[1,128], index: 6, kind: input, shape index: {}]   ;;  %s1267_s7 = inlined_call_operand.hbm [shape: f32[16,128], index: 7, kind: output, shape index: {}]  }
   0x1   :  { %13 = vsyncpa [#allocation6], 0  ;;  %s32_s26 = sshll.u32 %s1261_s1, 4  ;;  %s33_s26 = int_to_ptr.hbm [resolvable:$true] %s32_s26 }
   0x2   :  { %14 = vsyncpa [#allocation4], 0  ;;  %s986_s27 = smov [#allocation5]   ;;  %s19_s8 = sshll.u32 %s1260_s0, 4  ;;  %s20_s8 = int_to_ptr.hbm [resolvable:$true] %s19_s8 }
   0x3   :  { %s34_s28 = sshll.u32 %s986_s27, 4  ;;  %s987_s9 = smov 64   ;;  %s35_s28 = int_to_ptr.vmem [resolvable:$true] %s34_s28 }
   0x4   :  { %s988_s10 = smov 4   ;;  %s989_s11 = smov [#allocation2]  }
   0x5   :  { %40 = dma.hbm_to_vmem [thread:$0]  %s33_s26, 1024, %s35_s28, [#allocation6], %s987_s9, %s987_s9, %s988_s10  }
   0x6   :  { %s21_s12 = sshll.u32 %s989_s11, 4  ;;  %s990_s13 = smov 128   ;;  %s22_s12 = int_to_ptr.vmem [resolvable:$true] %s21_s12 }
   0x7   :  { %s991_s14 = smov 8   ;;  %s51_s16 = sshll.u32 %s1265_s5, 4  ;;  %s52_s16 = int_to_ptr.hbm [resolvable:$true] %s51_s16 }
   0x8   :  { %27 = dma.hbm_to_vmem [thread:$0]  %s20_s8, 256, %s22_s12, [#allocation3], %s990_s13, %s990_s13, %s991_s14  }
   0x9   :  { %s992_s17 = smov [#allocation7]  }
   0xa   :  { %s53_s0 = sshll.u32 %s992_s17, 4  ;;  %s54_s0 = int_to_ptr.vmem [resolvable:$true] %s53_s0 }
   0xb   :  { %59 = dma.hbm_to_vmem [thread:$0]  %s52_s16, 1024, %s54_s0, [#allocation6], %s987_s9, %s987_s9, %s988_s10  }
   0xc   :  { %980 = dma.done.wait [#allocation3], 256  }
   0xd   :  { %981 = vsyncadd [#allocation3], 4294967040 }
   0xe   :  { %982 = dma.done.wait [#allocation6], 2048  }
   0xf   :  { %983 = vsyncadd [#allocation6], 4294965248  ;;  %v993_v0 = vmov 1   ;;  %v994_v1 = vmov 0   ;;  %v995_v2 = vmov 2   ;;  %v1083_v3 = vld [vmem:[#allocation2] sm:$0xff]  ;;  %v76_v23 = vlaneseq }
  0x10   :  { %812 = vset.pattern.permute.xlu1 %v993_v0  ;;  %811 = vset.pattern.permute.xlu0 %v994_v1  ;;  %v1088_v4 = vld [vmem:[#allocation2 + $0x8] sm:$0xff]  ;;  %v996_v5 = vmov 3   ;;  %v997_v6 = vmov 4   ;;  %v998_v7 = vmov 5   ;;  %v999_v8 = vmov 6   ;;  %s1030_s23 = smov [#allocation8]  }
  0x11   :  { %813 = vset.pattern.permute.xlu2 %v995_v2  ;;  %89 = vperm.xlu1 %812, %v1083_v3   ;;  %v1000_v9 = vmov 8   ;;  %v1001_v10 = vmov 7   ;;  %v1002_v11 = vmov 10   ;;  %v1003_v12 = vmov 13   ;;  %s669_s24 = sshll.u32 %s1030_s23, 4  ;;  %s671_s26 = sshll.u32 %s1267_s7, 4  ;;  %s670_s24 = int_to_ptr.vmem [resolvable:$true] %s669_s24  ;;  %s672_s26 = int_to_ptr.hbm [resolvable:$true] %s671_s26 }
  0x12   :  { %79 = vperm.xlu0 %811, %v1083_v3   ;;  %99 = vperm.xlu2 %813, %v1083_v3   ;;  %v1004_v13 = vmov 9   ;;  %v1005_v14 = vmov 15   ;;  %v1006_v15 = vmov 11   ;;  %v1007_v16 = vmov 12  }
  0x13   :  { %v1008_v17 = vmov 18   ;;  %v1009_v18 = vmov 14   ;;  %v1010_v21 = vmov 20   ;;  %v1011_v22 = vmov 16  }
  0x14   :  { %v1124_v25 = vand.u32 127, %v76_v23  ;;  %v1012_v28 = vmov 17   ;;  %v1013_v29 = vmov 0.0   ;;  %v1014_v34 = vmov 23  }
  0x15   :  { %v1015_v40 = vmov 19   ;;  %v1016_v48 = vmov 25   ;;  %v1017_v53 = vmov 21   ;;  %v1018_v60 = vmov 22  }
  0x16   :  { %v1019_v62 = vmov 28  }
  0x19   :  { %92 = vperm.xlu1 %812, %v1088_v4  }
  0x1a   :  { %82 = vperm.xlu0 %811, %v1088_v4   ;;  %102 = vperm.xlu2 %813, %v1088_v4  }
  0x21   :  { %815 = vset.pattern.permute.xlu1 %v996_v5 }
  0x22   :  { %814 = vset.pattern.permute.xlu0 %v996_v5  ;;  %112 = vperm.xlu1 %815, %v1088_v4  }
  0x23   :  { %109 = vperm.xlu0 %814, %v1083_v3   ;;  %816 = vset.pattern.permute.xlu2 %v997_v6 }
  0x24   :  { %119 = vperm.xlu2 %816, %v1083_v3  }
  0x2a   :  { %817 = vset.pattern.permute.xlu1 %v997_v6  ;;  %v1020_v6 = vmov 24  }
  0x2b   :  { %819 = vset.pattern.permute.xlu0 %v998_v7  ;;  %122 = vperm.xlu1 %817, %v1088_v4  }
  0x2c   :  { %132 = vperm.xlu0 %819, %v1088_v4   ;;  %818 = vset.pattern.permute.xlu2 %v998_v7 }
  0x2d   :  { %129 = vperm.xlu2 %818, %v1083_v3  }
  0x33   :  { %820 = vset.pattern.permute.xlu1 %v999_v8 }
  0x34   :  { %824 = vset.pattern.permute.xlu0 %v1000_v9  ;;  %139 = vperm.xlu1 %820, %v1083_v3  }
  0x35   :  { %159 = vperm.xlu0 %824, %v1083_v3   ;;  %821 = vset.pattern.permute.xlu2 %v999_v8 }
  0x36   :  { %142 = vperm.xlu2 %821, %v1088_v4  }
  0x3c   :  { %822 = vset.pattern.permute.xlu1 %v1001_v10 }
  0x3d   :  { %829 = vset.pattern.permute.xlu0 %v1002_v11  ;;  %149 = vperm.xlu1 %822, %v1083_v3  }
  0x3e   :  { %182 = vperm.xlu0 %829, %v1088_v4   ;;  %823 = vset.pattern.permute.xlu2 %v1001_v10 }
  0x3f   :  { %152 = vperm.xlu2 %823, %v1088_v4  }
  0x45   :  { %825 = vset.pattern.permute.xlu1 %v1000_v9 }
  0x46   :  { %834 = vset.pattern.permute.xlu0 %v1003_v12  ;;  %162 = vperm.xlu1 %825, %v1088_v4  }
  0x47   :  { %209 = vperm.xlu0 %834, %v1083_v3   ;;  %826 = vset.pattern.permute.xlu2 %v1004_v13 }
  0x48   :  { %169 = vperm.xlu2 %826, %v1083_v3  }
  0x4e   :  { %827 = vset.pattern.permute.xlu1 %v1004_v13 }
  0x4f   :  { %172 = vperm.xlu1 %827, %v1088_v4   ;;  %839 = vset.pattern.permute.xlu0 %v1005_v14 }
  0x50   :  { %828 = vset.pattern.permute.xlu2 %v1002_v11  ;;  %232 = vperm.xlu0 %839, %v1088_v4  }
  0x51   :  { %179 = vperm.xlu2 %828, %v1083_v3  }
  0x57   :  { %830 = vset.pattern.permute.xlu1 %v1006_v15 }
  0x58   :  { %189 = vperm.xlu1 %830, %v1083_v3   ;;  %844 = vset.pattern.permute.xlu0 %v1008_v17 }
  0x59   :  { %831 = vset.pattern.permute.xlu2 %v1006_v15  ;;  %259 = vperm.xlu0 %844, %v1083_v3  }
  0x5a   :  { %192 = vperm.xlu2 %831, %v1088_v4  }
  0x60   :  { %832 = vset.pattern.permute.xlu1 %v1007_v16 }
  0x61   :  { %199 = vperm.xlu1 %832, %v1083_v3   ;;  %849 = vset.pattern.permute.xlu0 %v1010_v21 }
  0x62   :  { %833 = vset.pattern.permute.xlu2 %v1007_v16  ;;  %282 = vperm.xlu0 %849, %v1088_v4   ;;  %v1022_v16 = vmov 26  }
  0x63   :  { %202 = vperm.xlu2 %833, %v1088_v4  }
  0x69   :  { %835 = vset.pattern.permute.xlu1 %v1003_v12  ;;  %v1021_v12 = vmov 30  }
  0x6a   :  { %212 = vperm.xlu1 %835, %v1088_v4   ;;  %854 = vset.pattern.permute.xlu0 %v1014_v34 }
  0x6b   :  { %836 = vset.pattern.permute.xlu2 %v1009_v18  ;;  %309 = vperm.xlu0 %854, %v1083_v3  }
  0x6c   :  { %219 = vperm.xlu2 %836, %v1083_v3   ;;  %v100_v19 = vpop.permute.xlu2 %99 }
  0x6d   :  { %vm104_vm0 = vcmp.eq.s32.totalorder %v1124_v25, %v100_v19 }
  0x72   :  { %837 = vset.pattern.permute.xlu1 %v1009_v18 }
  0x73   :  { %222 = vperm.xlu1 %837, %v1088_v4   ;;  %859 = vset.pattern.permute.xlu0 %v1016_v48 }
  0x74   :  { %838 = vset.pattern.permute.xlu2 %v1005_v14  ;;  %v103_v20 = vpop.permute.xlu2 %102  ;;  %332 = vperm.xlu0 %859, %v1088_v4  }
  0x75   :  { %229 = vperm.xlu2 %838, %v1083_v3   ;;  %vm105_vm5 = vcmp.eq.s32.totalorder %v1124_v25, %v103_v20 }
  0x7b   :  { %840 = vset.pattern.permute.xlu1 %v1011_v22 }
  0x7c   :  { %239 = vperm.xlu1 %840, %v1083_v3   ;;  %864 = vset.pattern.permute.xlu0 %v1019_v62 }
  0x7d   :  { %841 = vset.pattern.permute.xlu2 %v1011_v22  ;;  %359 = vperm.xlu0 %864, %v1083_v3  }
  0x7e   :  { %242 = vperm.xlu2 %841, %v1088_v4   ;;  %v120_v24 = vpop.permute.xlu2 %119 }
  0x7f   :  { %vm124_vm6 = vcmp.eq.s32.totalorder %v1124_v25, %v120_v24  ;;  %v1023_v24 = vmov 27  }
  0x83   :  { %v90_v26 = vpop.permute.xlu1 %89 }
  0x84   :  { %v80_v27 = vpop.permute.xlu0 %79  ;;  %vm94_vm1 = vcmp.eq.s32.totalorder %v1124_v25, %v90_v26  ;;  %842 = vset.pattern.permute.xlu1 %v1012_v28 }
  0x85   :  { %vm84_vm2 = vcmp.eq.s32.totalorder %v1124_v25, %v80_v27  ;;  %249 = vperm.xlu1 %842, %v1083_v3   ;;  %869 = vset.pattern.permute.xlu0 %v1021_v12  ;;  %v1024_v27 = vmov 33  }
  0x86   :  { %v86_v30 = vsel %vm84_vm2, 1.0, %v1013_v29  ;;  %843 = vset.pattern.permute.xlu2 %v1012_v28  ;;  %382 = vperm.xlu0 %869, %v1088_v4  }
  0x87   :  { %v96_v31 = vsel %vm94_vm1, 1.0, %v86_v30  ;;  %252 = vperm.xlu2 %843, %v1088_v4   ;;  %v130_v33 = vpop.permute.xlu2 %129 }
  0x88   :  { %v106_v32 = vsel %vm104_vm0, 1.0, %v96_v31  ;;  %vm134_vm7 = vcmp.eq.s32.totalorder %v1124_v25, %v130_v33 }
  0x8b   :  { %v93_v35 = vpop.permute.xlu1 %92 }
  0x8c   :  { %v83_v36 = vpop.permute.xlu0 %82  ;;  %vm95_vm3 = vcmp.eq.s32.totalorder %v1124_v25, %v93_v35 }
  0x8d   :  { %vm85_vm4 = vcmp.eq.s32.totalorder %v1124_v25, %v83_v36  ;;  %845 = vset.pattern.permute.xlu1 %v1008_v17 }
  0x8e   :  { %v87_v37 = vsel %vm85_vm4, 1.0, %v1013_v29  ;;  %262 = vperm.xlu1 %845, %v1088_v4   ;;  %874 = vset.pattern.permute.xlu0 %v1024_v27 }
  0x8f   :  { %v97_v38 = vsel %vm95_vm3, 1.0, %v87_v37  ;;  %846 = vset.pattern.permute.xlu2 %v1015_v40  ;;  %409 = vperm.xlu0 %874, %v1083_v3  }
  0x90   :  { %v107_v39 = vsel %vm105_vm5, 1.0, %v97_v38  ;;  %269 = vperm.xlu2 %846, %v1083_v3   ;;  %v143_v41 = vpop.permute.xlu2 %142 }
  0x91   :  { %vm145_vm10 = vcmp.eq.s32.totalorder %v1124_v25, %v143_v41 }
  0x94   :  { %v113_v42 = vpop.permute.xlu1 %112 }
  0x95   :  { %v110_v43 = vpop.permute.xlu0 %109  ;;  %vm115_vm8 = vcmp.eq.s32.totalorder %v1124_v25, %v113_v42 }
  0x96   :  { %vm114_vm9 = vcmp.eq.s32.totalorder %v1124_v25, %v110_v43  ;;  %v117_v44 = vsel %vm115_vm8, 1.0, %v107_v39  ;;  %847 = vset.pattern.permute.xlu1 %v1015_v40  ;;  %v1026_v40 = vmov 35  }
  0x97   :  { %v116_v45 = vsel %vm114_vm9, 1.0, %v106_v32  ;;  %272 = vperm.xlu1 %847, %v1088_v4   ;;  %879 = vset.pattern.permute.xlu0 %v1026_v40 }
  0x98   :  { %v126_v46 = vsel %vm124_vm6, 1.0, %v116_v45  ;;  %848 = vset.pattern.permute.xlu2 %v1010_v21  ;;  %432 = vperm.xlu0 %879, %v1088_v4  }
  0x99   :  { %v136_v47 = vsel %vm134_vm7, 1.0, %v126_v46  ;;  %279 = vperm.xlu2 %848, %v1083_v3   ;;  %v153_v49 = vpop.permute.xlu2 %152 }
  0x9a   :  { %vm155_vm13 = vcmp.eq.s32.totalorder %v1124_v25, %v153_v49 }
  0x9d   :  { %v123_v50 = vpop.permute.xlu1 %122 }
  0x9e   :  { %v133_v51 = vpop.permute.xlu0 %132  ;;  %vm125_vm11 = vcmp.eq.s32.totalorder %v1124_v25, %v123_v50 }
  0x9f   :  { %vm135_vm12 = vcmp.eq.s32.totalorder %v1124_v25, %v133_v51  ;;  %v127_v52 = vsel %vm125_vm11, 1.0, %v117_v44  ;;  %850 = vset.pattern.permute.xlu1 %v1017_v53  ;;  %v1027_v44 = vmov 31   ;;  %v1028_v51 = vmov 32  }
  0xa0   :  { %v137_v54 = vsel %vm135_vm12, 1.0, %v127_v52  ;;  %289 = vperm.xlu1 %850, %v1083_v3  }
  0xa1   :  { %v147_v55 = vsel %vm145_vm10, 1.0, %v137_v54  ;;  %851 = vset.pattern.permute.xlu2 %v1017_v53 }
  0xa2   :  { %v157_v56 = vsel %vm155_vm13, 1.0, %v147_v55  ;;  %292 = vperm.xlu2 %851, %v1088_v4   ;;  %v170_v57 = vpop.permute.xlu2 %169 }
  0xa3   :  { %vm174_vm0 = vcmp.eq.s32.totalorder %v1124_v25, %v170_v57 }
  0xa6   :  { %v140_v58 = vpop.permute.xlu1 %139 }
  0xa7   :  { %vm144_vm14 = vcmp.eq.s32.totalorder %v1124_v25, %v140_v58  ;;  %v160_v61 = vpop.permute.xlu0 %159  ;;  %v1029_v58 = vmov 34  }
  0xa8   :  { %v146_v59 = vsel %vm144_vm14, 1.0, %v136_v47  ;;  %852 = vset.pattern.permute.xlu1 %v1018_v60  ;;  %vm164_vm15 = vcmp.eq.s32.totalorder %v1124_v25, %v160_v61 }
  0xa9   :  { %299 = vperm.xlu1 %852, %v1083_v3  }
  0xaa   :  { %853 = vset.pattern.permute.xlu2 %v1018_v60 }
  0xab   :  { %302 = vperm.xlu2 %853, %v1088_v4   ;;  %v180_v63 = vpop.permute.xlu2 %179 }
  0xac   :  { %vm184_vm2 = vcmp.eq.s32.totalorder %v1124_v25, %v180_v63 }
  0xaf   :  { %v150_v0 = vpop.permute.xlu1 %149 }
  0xb0   :  { %vm154_vm1 = vcmp.eq.s32.totalorder %v1124_v25, %v150_v0  ;;  %v183_v11 = vpop.permute.xlu0 %182 }
  0xb1   :  { %v156_v1 = vsel %vm154_vm1, 1.0, %v146_v59  ;;  %855 = vset.pattern.permute.xlu1 %v1014_v34  ;;  %vm185_vm4 = vcmp.eq.s32.totalorder %v1124_v25, %v183_v11  ;;  %v1025_v34 = vmov 29  }
  0xb2   :  { %v166_v2 = vsel %vm164_vm15, 1.0, %v156_v1  ;;  %312 = vperm.xlu1 %855, %v1088_v4  }
  0xb3   :  { %v176_v5 = vsel %vm174_vm0, 1.0, %v166_v2  ;;  %856 = vset.pattern.permute.xlu2 %v1020_v6 }
  0xb4   :  { %v186_v7 = vsel %vm184_vm2, 1.0, %v176_v5  ;;  %319 = vperm.xlu2 %856, %v1083_v3   ;;  %v193_v8 = vpop.permute.xlu2 %192 }
  0xb5   :  { %vm195_vm5 = vcmp.eq.s32.totalorder %v1124_v25, %v193_v8 }
  0xb8   :  { %v163_v9 = vpop.permute.xlu1 %162 }
  0xb9   :  { %vm165_vm3 = vcmp.eq.s32.totalorder %v1124_v25, %v163_v9  ;;  %v210_v26 = vpop.permute.xlu0 %209 }
  0xba   :  { %v167_v10 = vsel %vm165_vm3, 1.0, %v157_v56  ;;  %857 = vset.pattern.permute.xlu1 %v1020_v6  ;;  %vm214_vm9 = vcmp.eq.s32.totalorder %v1124_v25, %v210_v26  ;;  %v753_v26 = vld [vmem:[#allocation5 + $0x18] sm:$0xff] }
  0xbb   :  { %322 = vperm.xlu1 %857, %v1088_v4  }
  0xbc   :  { %858 = vset.pattern.permute.xlu2 %v1016_v48 }
  0xbd   :  { %329 = vperm.xlu2 %858, %v1083_v3   ;;  %v203_v13 = vpop.permute.xlu2 %202 }
  0xbe   :  { %vm205_vm7 = vcmp.eq.s32.totalorder %v1124_v25, %v203_v13 }
  0xc1   :  { %v173_v14 = vpop.permute.xlu1 %172 }
  0xc2   :  { %vm175_vm6 = vcmp.eq.s32.totalorder %v1124_v25, %v173_v14  ;;  %v233_v39 = vpop.permute.xlu0 %232 }
  0xc3   :  { %v177_v15 = vsel %vm175_vm6, 1.0, %v167_v10  ;;  %860 = vset.pattern.permute.xlu1 %v1022_v16  ;;  %vm235_vm14 = vcmp.eq.s32.totalorder %v1124_v25, %v233_v39 }
  0xc4   :  { %v187_v17 = vsel %vm185_vm4, 1.0, %v177_v15  ;;  %339 = vperm.xlu1 %860, %v1083_v3  }
  0xc5   :  { %v197_v18 = vsel %vm195_vm5, 1.0, %v187_v17  ;;  %861 = vset.pattern.permute.xlu2 %v1022_v16  ;;  %v757_v16 = vld [vmem:[#allocation5 + $0x38] sm:$0xff] }
  0xc6   :  { %v207_v19 = vsel %vm205_vm7, 1.0, %v197_v18  ;;  %342 = vperm.xlu2 %861, %v1088_v4   ;;  %v220_v20 = vpop.permute.xlu2 %219  ;;  %518 = vmatpush.bf16.msra.mxu0 %v757_v16  ;;  %v756_v18 = vld [vmem:[#allocation5 + $0x30] sm:$0xff]  ;;  %v763_v16 = vld [vmem:[#allocation7 + $0x28] sm:$0xff] }
  0xc7   :  { %vm224_vm10 = vcmp.eq.s32.totalorder %v1124_v25, %v220_v20  ;;  %v755_v20 = vld [vmem:[#allocation5 + $0x28] sm:$0xff] }
  0xca   :  { %v190_v21 = vpop.permute.xlu1 %189  ;;  %519 = vmatpush.bf16.msra.mxu0 %v756_v18 }
  0xcb   :  { %vm194_vm8 = vcmp.eq.s32.totalorder %v1124_v25, %v190_v21  ;;  %v260_v52 = vpop.permute.xlu0 %259 }
  0xcc   :  { %v196_v22 = vsel %vm194_vm8, 1.0, %v186_v7  ;;  %862 = vset.pattern.permute.xlu1 %v1023_v24  ;;  %vm264_vm3 = vcmp.eq.s32.totalorder %v1124_v25, %v260_v52 }
  0xcd   :  { %349 = vperm.xlu1 %862, %v1083_v3  }
  0xce   :  { %863 = vset.pattern.permute.xlu2 %v1023_v24  ;;  %520 = vmatpush.bf16.msra.mxu0 %v755_v20  ;;  %v762_v20 = vld [vmem:[#allocation7 + $0x20] sm:$0xff] }
  0xcf   :  { %352 = vperm.xlu2 %863, %v1088_v4   ;;  %v230_v28 = vpop.permute.xlu2 %229 }
  0xd0   :  { %vm234_vm12 = vcmp.eq.s32.totalorder %v1124_v25, %v230_v28 }
  0xd3   :  { %v200_v30 = vpop.permute.xlu1 %199 }
  0xd4   :  { %vm204_vm11 = vcmp.eq.s32.totalorder %v1124_v25, %v200_v30  ;;  %v283_v63 = vpop.permute.xlu0 %282  ;;  %v752_v30 = vld [vmem:[#allocation5 + $0x10] sm:$0xff] }
  0xd5   :  { %v206_v31 = vsel %vm204_vm11, 1.0, %v196_v22  ;;  %865 = vset.pattern.permute.xlu1 %v1019_v62  ;;  %vm285_vm8 = vcmp.eq.s32.totalorder %v1124_v25, %v283_v63  ;;  %v754_v22 = vld [vmem:[#allocation5 + $0x20] sm:$0xff] }
  0xd6   :  { %v216_v32 = vsel %vm214_vm9, 1.0, %v206_v31  ;;  %362 = vperm.xlu1 %865, %v1088_v4   ;;  %521 = vmatpush.bf16.msra.mxu0 %v754_v22  ;;  %v751_v31 = vld [vmem:[#allocation5 + $0x8] sm:$0xff] }
  0xd7   :  { %v226_v33 = vsel %vm224_vm10, 1.0, %v216_v32  ;;  %866 = vset.pattern.permute.xlu2 %v1025_v34 }
  0xd8   :  { %v236_v35 = vsel %vm234_vm12, 1.0, %v226_v33  ;;  %369 = vperm.xlu2 %866, %v1083_v3   ;;  %v243_v36 = vpop.permute.xlu2 %242 }
  0xd9   :  { %vm245_vm15 = vcmp.eq.s32.totalorder %v1124_v25, %v243_v36 }
  0xda   :  { %522 = vmatpush.bf16.msra.mxu0 %v753_v26  ;;  %v761_v26 = vld [vmem:[#allocation7 + $0x18] sm:$0xff] }
  0xdc   :  { %v213_v37 = vpop.permute.xlu1 %212 }
  0xdd   :  { %vm215_vm13 = vcmp.eq.s32.totalorder %v1124_v25, %v213_v37 }
  0xde   :  { %v217_v38 = vsel %vm215_vm13, 1.0, %v207_v19  ;;  %867 = vset.pattern.permute.xlu1 %v1025_v34  ;;  %523 = vmatpush.bf16.msra.mxu0 %v752_v30 }
  0xdf   :  { %372 = vperm.xlu1 %867, %v1088_v4  }
  0xe0   :  { %868 = vset.pattern.permute.xlu2 %v1021_v12 }
  0xe1   :  { %379 = vperm.xlu2 %868, %v1083_v3   ;;  %v253_v41 = vpop.permute.xlu2 %252 }
  0xe2   :  { %vm255_vm1 = vcmp.eq.s32.totalorder %v1124_v25, %v253_v41  ;;  %524 = vmatpush.bf16.msra.mxu0 %v751_v31 }
  0xe5   :  { %v223_v42 = vpop.permute.xlu1 %222 }
  0xe6   :  { %vm225_vm0 = vcmp.eq.s32.totalorder %v1124_v25, %v223_v42 }
  0xe7   :  { %v227_v43 = vsel %vm225_vm0, 1.0, %v217_v38  ;;  %870 = vset.pattern.permute.xlu1 %v1027_v44 }
  0xe8   :  { %v237_v45 = vsel %vm235_vm14, 1.0, %v227_v43  ;;  %389 = vperm.xlu1 %870, %v1083_v3  }
  0xe9   :  { %v247_v46 = vsel %vm245_vm15, 1.0, %v237_v45  ;;  %871 = vset.pattern.permute.xlu2 %v1027_v44 }
  0xea   :  { %v257_v47 = vsel %vm255_vm1, 1.0, %v247_v46  ;;  %392 = vperm.xlu2 %871, %v1088_v4   ;;  %v270_v48 = vpop.permute.xlu2 %269 }
  0xeb   :  { %vm274_vm4 = vcmp.eq.s32.totalorder %v1124_v25, %v270_v48 }
  0xee   :  { %v240_v49 = vpop.permute.xlu1 %239 }
  0xef   :  { %vm244_vm2 = vcmp.eq.s32.totalorder %v1124_v25, %v240_v49 }
  0xf0   :  { %v246_v50 = vsel %vm244_vm2, 1.0, %v236_v35  ;;  %872 = vset.pattern.permute.xlu1 %v1028_v51  ;;  %v750_v35 = vld [vmem:[#allocation5] sm:$0xff] }
  0xf1   :  { %399 = vperm.xlu1 %872, %v1083_v3   ;;  %525 = vmatpush.bf16.msra.mxu0 %v750_v35 }
  0xf2   :  { %873 = vset.pattern.permute.xlu2 %v1028_v51 }
  0xf3   :  { %402 = vperm.xlu2 %873, %v1088_v4   ;;  %v280_v53 = vpop.permute.xlu2 %279 }
  0xf4   :  { %vm284_vm6 = vcmp.eq.s32.totalorder %v1124_v25, %v280_v53 }
  0xf7   :  { %v250_v54 = vpop.permute.xlu1 %249 }
  0xf8   :  { %vm254_vm5 = vcmp.eq.s32.totalorder %v1124_v25, %v250_v54 }
  0xf9   :  { %v256_v55 = vsel %vm254_vm5, 1.0, %v246_v50  ;;  %875 = vset.pattern.permute.xlu1 %v1024_v27  ;;  %v310_v27 = vpop.permute.xlu0 %309 }
  0xfa   :  { %v266_v56 = vsel %vm264_vm3, 1.0, %v256_v55  ;;  %412 = vperm.xlu1 %875, %v1088_v4   ;;  %vm314_vm14 = vcmp.eq.s32.totalorder %v1124_v25, %v310_v27 }
  0xfb   :  { %v276_v57 = vsel %vm274_vm4, 1.0, %v266_v56  ;;  %876 = vset.pattern.permute.xlu2 %v1029_v58 }
  0xfc   :  { %v286_v59 = vsel %vm284_vm6, 1.0, %v276_v57  ;;  %419 = vperm.xlu2 %876, %v1083_v3   ;;  %v293_v60 = vpop.permute.xlu2 %292 }
  0xfd   :  { %vm295_vm9 = vcmp.eq.s32.totalorder %v1124_v25, %v293_v60 }
 0x100   :  { %v263_v61 = vpop.permute.xlu1 %262 }
 0x101   :  { %vm265_vm7 = vcmp.eq.s32.totalorder %v1124_v25, %v263_v61  ;;  %v333_v33 = vpop.permute.xlu0 %332 }
 0x102   :  { %v267_v62 = vsel %vm265_vm7, 1.0, %v257_v47  ;;  %877 = vset.pattern.permute.xlu1 %v1029_v58  ;;  %vm335_vm4 = vcmp.eq.s32.totalorder %v1124_v25, %v333_v33 }
 0x103   :  { %422 = vperm.xlu1 %877, %v1088_v4  }
 0x104   :  { %878 = vset.pattern.permute.xlu2 %v1026_v40 }
 0x105   :  { %429 = vperm.xlu2 %878, %v1083_v3   ;;  %v303_v0 = vpop.permute.xlu2 %302 }
 0x106   :  { %vm305_vm11 = vcmp.eq.s32.totalorder %v1124_v25, %v303_v0 }
 0x109   :  { %v273_v1 = vpop.permute.xlu1 %272  ;;  %v360_v36 = vpop.permute.xlu0 %359 }
 0x10a   :  { %vm275_vm10 = vcmp.eq.s32.totalorder %v1124_v25, %v273_v1  ;;  %vm364_vm7 = vcmp.eq.s32.totalorder %v1124_v25, %v360_v36  ;;  %v759_v36 = vld [vmem:[#allocation7 + $0x8] sm:$0xff] }
 0x10b   :  { %v277_v2 = vsel %vm275_vm10, 1.0, %v267_v62 }
 0x10c   :  { %v287_v5 = vsel %vm285_vm8, 1.0, %v277_v2 }
 0x10d   :  { %v297_v6 = vsel %vm295_vm9, 1.0, %v287_v5 }
 0x10e   :  { %v307_v7 = vsel %vm305_vm11, 1.0, %v297_v6  ;;  %v320_v10 = vpop.permute.xlu2 %319 }
 0x10f   :  { %vm324_vm15 = vcmp.eq.s32.totalorder %v1124_v25, %v320_v10  ;;  %v880_v10 = vld [vmem:[%s1262_s2] ss:$0 sm:$0xff] }
 0x111   :  { %v383_v44 = vpop.permute.xlu0 %382 }
 0x112   :  { %v290_v8 = vpop.permute.xlu1 %289 }
 0x113   :  { %vm294_vm12 = vcmp.eq.s32.totalorder %v1124_v25, %v290_v8 }
 0x114   :  { %v296_v4 = vsel %vm294_vm12, 1.0, %v286_v59 }
 0x117   :  { %v330_v12 = vpop.permute.xlu2 %329 }
 0x118   :  { %vm334_vm2 = vcmp.eq.s32.totalorder %v1124_v25, %v330_v12 }
 0x119   :  { %v410_v54 = vpop.permute.xlu0 %409 }
 0x11b   :  { %v300_v3 = vpop.permute.xlu1 %299 }
 0x11c   :  { %vm304_vm13 = vcmp.eq.s32.totalorder %v1124_v25, %v300_v3 }
 0x11d   :  { %v306_v9 = vsel %vm304_vm13, 1.0, %v296_v4 }
 0x11e   :  { %v316_v38 = vsel %vm314_vm14, 1.0, %v306_v9  ;;  %vm385_vm14 = vcmp.eq.s32.totalorder %v1124_v25, %v383_v44 }
 0x11f   :  { %v326_v39 = vsel %vm324_vm15, 1.0, %v316_v38 }
 0x120   :  { %v343_v14 = vpop.permute.xlu2 %342  ;;  %v336_v43 = vsel %vm334_vm2, 1.0, %v326_v39 }
 0x121   :  { %vm345_vm6 = vcmp.eq.s32.totalorder %v1124_v25, %v343_v14  ;;  %v433_v1 = vpop.permute.xlu0 %432  ;;  %v764_v14 = vld [vmem:[#allocation7 + $0x30] sm:$0xff] }
 0x124   :  { %v313_v11 = vpop.permute.xlu1 %312 }
 0x125   :  { %vm315_vm0 = vcmp.eq.s32.totalorder %v1124_v25, %v313_v11  ;;  %v765_v11 = vld [vmem:[#allocation7 + $0x38] sm:$0xff] }
 0x126   :  { %v317_v40 = vsel %vm315_vm0, 1.0, %v307_v7  ;;  %649 = vmatpush.bf16.msra.mxu1 %v765_v11 }
 0x129   :  { %v353_v17 = vpop.permute.xlu2 %352 }
 0x12a   :  { %vm355_vm8 = vcmp.eq.s32.totalorder %v1124_v25, %v353_v17  ;;  %650 = vmatpush.bf16.msra.mxu1 %v764_v14 }
 0x12d   :  { %v323_v13 = vpop.permute.xlu1 %322 }
 0x12e   :  { %vm325_vm1 = vcmp.eq.s32.totalorder %v1124_v25, %v323_v13  ;;  %v440_v13 = vshrl.u32 %v76_v23, 7  ;;  %651 = vmatpush.bf16.msra.mxu1 %v763_v16 }
 0x12f   :  { %v327_v42 = vsel %vm325_vm1, 1.0, %v317_v40  ;;  %vm414_vm1 = vcmp.eq.s32.totalorder %v1124_v25, %v410_v54 }
 0x130   :  { %v337_v47 = vsel %vm335_vm4, 1.0, %v327_v42 }
 0x131   :  { %v347_v49 = vsel %vm345_vm6, 1.0, %v337_v47  ;;  %vm435_vm6 = vcmp.eq.s32.totalorder %v1124_v25, %v433_v1 }
 0x132   :  { %v370_v21 = vpop.permute.xlu2 %369  ;;  %v357_v52 = vsel %vm355_vm8, 1.0, %v347_v49  ;;  %vm442_vm8 = vcmp.lt.s32.totalorder %v440_v13, 4  ;;  %652 = vmatpush.bf16.msra.mxu1 %v762_v20 }
 0x133   :  { %vm374_vm9 = vcmp.eq.s32.totalorder %v1124_v25, %v370_v21  ;;  %v685_v17 = vsel %vm442_vm8, 1.0, %v1013_v29 }
 0x136   :  { %v340_v15 = vpop.permute.xlu1 %339  ;;  %653 = vmatpush.bf16.msra.mxu1 %v761_v26 }
 0x137   :  { %vm344_vm3 = vcmp.eq.s32.totalorder %v1124_v25, %v340_v15 }
 0x138   :  { %v346_v45 = vsel %vm344_vm3, 1.0, %v336_v43 }
 0x13b   :  { %v380_v28 = vpop.permute.xlu2 %379 }
 0x13c   :  { %vm384_vm12 = vcmp.eq.s32.totalorder %v1124_v25, %v380_v28 }
 0x13f   :  { %v350_v19 = vpop.permute.xlu1 %349 }
 0x140   :  { %vm354_vm5 = vcmp.eq.s32.totalorder %v1124_v25, %v350_v19 }
 0x141   :  { %v356_v48 = vsel %vm354_vm5, 1.0, %v346_v45 }
 0x142   :  { %v366_v50 = vsel %vm364_vm7, 1.0, %v356_v48 }
 0x143   :  { %v376_v53 = vsel %vm374_vm9, 1.0, %v366_v50 }
 0x144   :  { %v393_v34 = vpop.permute.xlu2 %392  ;;  %v386_v58 = vsel %vm384_vm12, 1.0, %v376_v53 }
 0x145   :  { %vm395_vm0 = vcmp.eq.s32.totalorder %v1124_v25, %v393_v34 }
 0x148   :  { %v363_v24 = vpop.permute.xlu1 %362 }
 0x149   :  { %vm365_vm10 = vcmp.eq.s32.totalorder %v1124_v25, %v363_v24 }
 0x14a   :  { %v367_v55 = vsel %vm365_vm10, 1.0, %v357_v52 }
 0x14d   :  { %v403_v41 = vpop.permute.xlu2 %402 }
 0x14e   :  { %vm405_vm2 = vcmp.eq.s32.totalorder %v1124_v25, %v403_v41  ;;  %v758_v41 = vld [vmem:[#allocation7] sm:$0xff] }
 0x151   :  { %v373_v32 = vpop.permute.xlu1 %372 }
 0x152   :  { %vm375_vm11 = vcmp.eq.s32.totalorder %v1124_v25, %v373_v32  ;;  %v760_v32 = vld [vmem:[#allocation7 + $0x10] sm:$0xff] }
 0x153   :  { %v377_v56 = vsel %vm375_vm11, 1.0, %v367_v55  ;;  %654 = vmatpush.bf16.msra.mxu1 %v760_v32  ;;  %v465_v55 = vld [vmem:[%s1263_s3] sm:$0x1] }
 0x154   :  { %v387_v60 = vsel %vm385_vm14, 1.0, %v377_v56 }
 0x155   :  { %v397_v62 = vsel %vm395_vm0, 1.0, %v387_v60 }
 0x156   :  { %v420_v51 = vpop.permute.xlu2 %419  ;;  %v407_v2 = vsel %vm405_vm2, 1.0, %v397_v62 }
 0x157   :  { %vm424_vm3 = vcmp.eq.s32.totalorder %v1124_v25, %v420_v51  ;;  %655 = vmatpush.bf16.msra.mxu1 %v759_v36 }
 0x15a   :  { %v390_v37 = vpop.permute.xlu1 %389 }
 0x15b   :  { %vm394_vm13 = vcmp.eq.s32.totalorder %v1124_v25, %v390_v37  ;;  %656 = vmatpush.bf16.msra.mxu1 %v758_v41 }
 0x15c   :  { %v396_v59 = vsel %vm394_vm13, 1.0, %v386_v58 }
 0x15f   :  { %v430_v0 = vpop.permute.xlu2 %429 }
 0x160   :  { %vm434_vm5 = vcmp.eq.s32.totalorder %v1124_v25, %v430_v0 }
 0x163   :  { %v400_v46 = vpop.permute.xlu1 %399 }
 0x164   :  { %vm404_vm15 = vcmp.eq.s32.totalorder %v1124_v25, %v400_v46 }
 0x165   :  { %v406_v61 = vsel %vm404_vm15, 1.0, %v396_v59  ;;  %v466_v59 = vld [vmem:[%s1264_s4] sm:$0x1] }
 0x166   :  { %v416_v63 = vsel %vm414_vm1, 1.0, %v406_v61 }
 0x167   :  { %v426_v5 = vsel %vm424_vm3, 1.0, %v416_v63 }
 0x168   :  { %v436_v4 = vsel %vm434_vm5, 1.0, %v426_v5 }
 0x16c   :  { %v413_v57 = vpop.permute.xlu1 %412 }
 0x16d   :  { %vm415_vm4 = vcmp.eq.s32.totalorder %v1124_v25, %v413_v57 }
 0x16e   :  { %v417_v7 = vsel %vm415_vm4, 1.0, %v407_v2 }
 0x175   :  { %v423_v6 = vpop.permute.xlu1 %422 }
 0x176   :  { %vm425_vm7 = vcmp.eq.s32.totalorder %v1124_v25, %v423_v6 }
 0x177   :  { %v427_v8 = vsel %vm425_vm7, 1.0, %v417_v7  ;;  %v881_v7 = vld [vmem:[%s1266_s6] ss:$0 sm:$0xff] }
 0x178   :  { %v437_v3 = vsel %vm435_vm6, 1.0, %v427_v8 }
 0x179   :  { %v438_v9 = vpack.c.bf16 %v437_v3, %v436_v4 }
 0x17b   :  { %526 = vmatmul.bf16.vlgmr.msra.gmra.mxu0 %v438_v9 }
 0x1f8   :  { %v527_v12 = vpop.f32.mrf.mxu0 }
 0x1f9   :  { %v528_v15 = vadd.f32 %v880_v10, %v527_v12 }
 0x1fb   :  { %v532_v25 = vmax.f32 %v528_v15, 0.0 }
 0x1fd   :  { %v534_v21 = vmul.f32 %v685_v17, %v532_v25 }
 0x1ff   :  { %v543_v27 = vmul.f32 %v534_v21, %v534_v21 }
 0x200   :  { %v529_v18 = vpop.f32.mrf.mxu0 }
 0x201   :  { %v530_v19 = vadd.f32 %v880_v10, %v529_v18 }
 0x203   :  { %v533_v22 = vmax.f32 %v530_v19, 0.0 }
 0x205   :  { %v535_v24 = vmul.f32 0.0, %v533_v22 }
 0x207   :  { %v536_v23 = vadd.f32 %v535_v24, %v534_v21  ;;  %v544_v28 = vmul.f32 %v535_v24, %v535_v24 }
 0x209   :  { %v537_v30 = vrot.slane %v536_v23, 4  ;;  %v545_v31 = vadd.f32 %v544_v28, %v543_v27 }
 0x20b   :  { %v538_v33 = vadd.f32 %v537_v30, %v536_v23  ;;  %v546_v34 = vrot.slane %v545_v31, 4 }
 0x20d   :  { %v539_v35 = vrot.slane %v538_v33, 2  ;;  %v547_v29 = vadd.f32 %v546_v34, %v545_v31 }
 0x20f   :  { %v540_v37 = vadd.f32 %v539_v35, %v538_v33  ;;  %v548_v38 = vrot.slane %v547_v29, 2 }
 0x211   :  { %v541_v39 = vrot.slane %v540_v37, 1  ;;  %v549_v40 = vadd.f32 %v548_v38, %v547_v29 }
 0x213   :  { %v550_v42 = vrot.slane %v549_v40, 1  ;;  %v542_v43 = vadd.f32 %v541_v39, %v540_v37 }
 0x215   :  { %v551_v44 = vadd.f32 %v550_v42, %v549_v40  ;;  %v552_v45 = vmul.f32 0.25, %v542_v43 }
 0x217   :  { %v553_v46 = vmul.f32 0.25, %v551_v44  ;;  %v554_v47 = vmul.f32 %v552_v45, %v552_v45 }
 0x219   :  { %v555_v48 = vsub.f32 %v553_v46, %v554_v47 }
 0x21b   :  { %v556_v49 = vadd.f32 1e-05, %v555_v48 }
 0x21d   :  { %882 = vrsqrt.f32 %v556_v49  ;;  %vm563_vm10 = vweird.f32 %v556_v49 }
 0x223   :  { %v883_v50 = vpop.eup %882 }
 0x224   :  { %v558_v51 = vmul.f32 %v883_v50, %v556_v49  ;;  %vm564_vm9 = vweird.f32 %v883_v50 }
 0x225   :  { %vm565_vm11 = vmor %vm563_vm10, %vm564_vm9 }
 0x226   :  { %v559_v52 = vmul.f32 %v883_v50, %v558_v51 }
 0x228   :  { %v560_v53 = vmul.f32 0.5, %v559_v52 }
 0x22a   :  { %v561_v54 = vsub.f32 1.5, %v560_v53 }
 0x22c   :  { %v562_v56 = vmul.f32 %v883_v50, %v561_v54 }
 0x22e   :  { %v566_v57 = vsel %vm565_vm11, %v883_v50, %v562_v56 }
 0x22f   :  { %v567_v58 = vmul.f32 %v566_v57, %v465_v55 }
 0x231   :  { %v568_v60 = vmul.f32 %v567_v58, %v552_v45  ;;  %v571_v61 = vperm.slane %v567_v58, 0 }
 0x233   :  { %v569_v62 = vsub.f32 %v466_v59, %v568_v60  ;;  %v573_v63 = vmul.f32 %v571_v61, %v534_v21  ;;  %v574_v0 = vmul.f32 %v571_v61, %v535_v24 }
 0x235   :  { %v576_v1 = vperm.slane %v569_v62, 0 }
 0x237   :  { %v578_v2 = vadd.f32 %v576_v1, %v573_v63  ;;  %v579_v5 = vadd.f32 %v576_v1, %v574_v0 }
 0x239   :  { %v580_v6 = vpack.c.bf16 %v579_v5, %v578_v2 }
 0x23b   :  { %657 = vmatmul.bf16.vlgmr.msra.gmra.mxu1 %v580_v6 }
 0x2b8   :  { %v658_v8 = vpop.f32.mrf.mxu1 }
 0x2b9   :  { %v659_v4 = vadd.f32 %v881_v7, %v658_v8 }
 0x2bb   :  { %663 = vst [vmem:[#allocation8] sm:$0xff] %v659_v4 }
 0x2c0   :  { %v660_v3 = vpop.f32.mrf.mxu1 }
 0x2c1   :  { %v661_v9 = vadd.f32 %v881_v7, %v660_v3 }
 0x2c3   :  { %664 = vst [vmem:[#allocation8 + $0x8] sm:$0xff] %v661_v9 }
 0x2c4   :  { %677 = dma.vmem_to_hbm [thread:$0]  %s670_s24, 256, %s672_s26, [#allocation4], %s990_s13, %s990_s13, %s991_s14  }
 0x2c5   :  { %984 = dma.done.wait [#allocation4], 256  }
 0x2c6   :  { %985 = vsyncadd [#allocation4], 4294967040 }
 0x2c7   :  { %682 = vsyncpa [#allocation3], 1 }
 0x2c8   :  { %683 = vsyncpa [#allocation6], 1 }
 0x2c9   :  { %684 = vsyncpa [#allocation4], 1 }

</bundles_post_ra>
